<compile_context>
chip_gen: v7x
topology: tpu7x:2x2x1
jax: 0.10.0
libtpu: 0.0.40
codegen_flags: <defaults>
</compile_context>

<pallas_src>
import functools

import numpy as np

import jax
import jax.numpy as jnp
from jax.experimental import pallas as pl
from jax.experimental.pallas import tpu as pltpu


def _split3_bf16(a):
    """Exact 3-limb bf16 decomposition of an f32 array (a0 + a1 + a2 ~= a)."""
    a0 = a.astype(jnp.bfloat16)
    r1 = a - a0.astype(jnp.float32)
    a1 = r1.astype(jnp.bfloat16)
    a2 = (r1 - a1.astype(jnp.float32)).astype(jnp.bfloat16)
    return a0, a1, a2


def _dot3(a_f32, p_bf16):
    """a_f32 @ p_bf16 with ~f32 accuracy using three native bf16 MXU passes.

    p_bf16 holds only 0.0 / 0.5 (exact in bf16, one nonzero per column), so
    the limb split reproduces the f32 result to ~2^-24 relative error while
    doing half the MXU passes of a precision=HIGHEST f32 matmul.
    """
    a0, a1, a2 = _split3_bf16(a_f32)
    dot = functools.partial(jnp.dot, preferred_element_type=jnp.float32)
    return dot(a0, p_bf16) + dot(a1, p_bf16) + dot(a2, p_bf16)


def _iwt_kernel(x_ref, p_ref, o_ref):
    # x_ref: (4, R, W)  -- x1..x4 planes for a tile of the flattened (C*H) axis
    # p_ref: (2W, 2W)   -- bf16 scatter matrix (0.5-scaled), resident in VMEM
    # o_ref: (R, 4W)    -- [out row 2i interleaved (2W) | out row 2i+1 (2W)]
    f32 = jnp.float32

    # Slice-then-cast per plane; butterfly (the 1/2 scale lives in p_ref).
    x1 = x_ref[0].astype(f32)
    x4 = x_ref[3].astype(f32)
    s = x1 + x4
    d = x1 - x4
    x2 = x_ref[1].astype(f32)
    x3 = x_ref[2].astype(f32)
    t = x2 + x3
    u = x2 - x3

    p = p_ref[...]
    # Even output rows: [e0 | e1] @ P -> e0 to even cols, e1 to odd cols.
    even = jnp.concatenate([s - t, d + u], axis=-1)          # (R, 2W)
    out_even = _dot3(even, p)                                # (R, 2W) f32
    # Odd output rows: [f0 | f1] @ P.
    odd = jnp.concatenate([d - u, s + t], axis=-1)           # (R, 2W)
    out_odd = _dot3(odd, p)                                  # (R, 2W) f32

    o_ref[...] = jnp.concatenate([out_even, out_odd], axis=-1).astype(o_ref.dtype)


@functools.lru_cache(maxsize=None)
def _interleave_matrix(W):
    """(2W, 2W) bf16 scatter matrix: row j -> col 2j (even cols), row W+j ->
    col 2j+1 (odd cols), with the iwt 1/2 scale folded in (0.5 exact in bf16)."""
    m = np.zeros((2 * W, 2 * W), np.float32)
    j = np.arange(W)
    m[j, 2 * j] = 0.5
    m[W + j, 2 * j + 1] = 0.5
    return jnp.asarray(m, dtype=jnp.bfloat16)


def _vmem_capacity_bytes():
    try:
        return int(pltpu.get_tpu_info().vmem_capacity_bytes)
    except Exception:
        return 64 * 1024 * 1024            # conservative: v7x per-core VMEM


def _round_up(n, m):
    return ((n + m - 1) // m) * m


def _pick_row_tile(rows, bytes_per_row, budget_bytes):
    """Row tile: multiple of 8 (sublane), within the VMEM budget, and giving
    >=2 row tiles when possible (v7x megacore: 2 TCs over the parallel grid,
    useful even at batch 1)."""
    if rows <= 8:
        return rows                        # full-dim block
    max_r = max(8, (budget_bytes // max(1, bytes_per_row)) // 8 * 8)
    r = min(max_r, _round_up(rows, 8))
    if r >= rows:                          # would be a single tile -> split
        r = max(8, _round_up((rows + 1) // 2, 8))
    return r


def iwt(x, out_dtype=jnp.float32):
    """Inverse 2x2 wavelet transform: (B, 4C, H, W) -> (B, C, 2H, 2W).

    out_dtype=jnp.bfloat16 halves the HBM write stream if the consumer accepts
    it (semantics change vs the f32 PyTorch module, so off by default).
    """
    B, C4, H, W = x.shape
    assert C4 % 4 == 0, "input channels must be divisible by 4"
    C = C4 // 4
    rows = C * H

    # Metadata-only view: plane q in [0,4) = channels [q*C, (q+1)*C) = x{q+1}.
    xr = x.reshape(B, 4, rows, W)
    pmat = _interleave_matrix(W)                       # (2W, 2W) bf16, resident

    # Honest VMEM accounting: double-buffered input + output blocks plus the
    # in-kernel f32/bf16 temporaries (~4 extra f32 copies of the tile), with
    # the resident scatter constant taken off the top of the budget.
    in_item = x.dtype.itemsize
    out_item = jnp.dtype(out_dtype).itemsize
    bytes_per_row = (2 * 4 * W * in_item               # input block  (2 buffers)
                     + 2 * 4 * W * out_item            # output block (2 buffers)
                     + 16 * W * 4)                     # live temporaries
    cap = _vmem_capacity_bytes()
    const_bytes = 2 * int(pmat.size) * pmat.dtype.itemsize
    budget = max(1 << 20, cap // 4 - const_bytes)
    R = _pick_row_tile(rows, bytes_per_row, budget)
    # Padded last row tile is fine: every output row depends only on its own
    # input rows, and Pallas only writes back the in-range part of the block.
    grid = (B, pl.cdiv(rows, R))

    vmem_limit = max(32 * 1024 * 1024, min(3 * cap // 4, 96 * 1024 * 1024))

    out = pl.pallas_call(
        _iwt_kernel,
        out_shape=jax.ShapeDtypeStruct((B, rows, 4 * W), out_dtype),
        grid=grid,
        in_specs=[
            pl.BlockSpec((None, 4, R, W), lambda b, t: (b, 0, t, 0)),
            # Constant block index -> DMA'd once, stays resident in VMEM.
            pl.BlockSpec((2 * W, 2 * W), lambda b, t: (0, 0)),
        ],
        out_specs=pl.BlockSpec((None, R, 4 * W), lambda b, t: (b, t, 0)),
        compiler_params=pltpu.CompilerParams(
            dimension_semantics=("parallel", "parallel"),
            vmem_limit_bytes=vmem_limit),
    )(xr, pmat)

    # (B, C*H, 4W) is exactly the memory layout of (B, C, 2H, 2W): metadata-only.
    return out.reshape(B, C, 2 * H, 2 * W)


def iwt_ref(x):
    # Pure-JAX reference replicating iwt_init semantics.
    B, C4, H, W = x.shape
    C = C4 // 4
    x = x.astype(jnp.float32)
    x1 = x[:, 0:C] / 2
    x2 = x[:, C:2 * C] / 2
    x3 = x[:, 2 * C:3 * C] / 2
    x4 = x[:, 3 * C:4 * C] / 2
    h = jnp.zeros((B, C, 2 * H, 2 * W), jnp.float32)
    h = h.at[:, :, 0::2, 0::2].set(x1 - x2 - x3 + x4)
    h = h.at[:, :, 1::2, 0::2].set(x1 - x2 + x3 - x4)
    h = h.at[:, :, 0::2, 1::2].set(x1 + x2 - x3 - x4)
    h = h.at[:, :, 1::2, 1::2].set(x1 + x2 + x3 + x4)
    return h


if __name__ == "__main__":
    key = jax.random.PRNGKey(0)
    k1, k2, k3 = jax.random.split(key, 3)

    # B=2, in_channels=16 (=> out_channels=4), 16x16 -> output (2, 4, 32, 32).
    x = jax.random.normal(k1, (2, 16, 16, 16), dtype=jnp.float32)
    y = jax.block_until_ready(iwt(x))
    y_ref = iwt_ref(x)
    assert y.shape == (2, 4, 32, 32), y.shape
    assert y.dtype == jnp.float32
    assert jnp.allclose(y, y_ref, atol=1e-4, rtol=1e-4), \
        float(jnp.max(jnp.abs(y - y_ref)))

    # B=1 (>=2 row tiles guaranteed for megacore) with a row count that does
    # not divide the tile -> exercises the padded last tile of the cdiv grid.
    x2 = jax.random.normal(k2, (1, 4, 40, 24), dtype=jnp.float32)
    y2 = jax.block_until_ready(iwt(x2))
    assert y2.shape == (1, 1, 80, 48)
    assert jnp.allclose(y2, iwt_ref(x2), atol=1e-4, rtol=1e-4)

    # bf16 input (cast to f32 inside the kernel), 4W = 128 lane-dense output.
    x3 = jax.random.normal(k3, (2, 8, 16, 32), dtype=jnp.bfloat16)
    y3 = jax.block_until_ready(iwt(x3))
    assert y3.shape == (2, 2, 32, 64)
    assert jnp.allclose(y3, iwt_ref(x3), atol=1e-4, rtol=1e-4)

    print("KERNEL_OK")
</pallas_src>

<mosaic_0001>
module attributes {stable_mosaic.version = 11 : i64} {
  func.func @_iwt_kernel(%arg0: i32, %arg1: i32, %arg2: memref<1x4x32x16xf32, #tpu.memory_space<vmem>>, %arg3: memref<32x32xbf16, #tpu.memory_space<vmem>>, %arg4: memref<1x32x64xf32, #tpu.memory_space<vmem>>) attributes {dimension_semantics = [#tpu.dimension_semantics<parallel>, #tpu.dimension_semantics<parallel>], iteration_bounds = array<i64: 2, 2>, scalar_prefetch = 0 : i64, scratch_operands = 0 : i64, tpu.core_type = #tpu.core_type<tc>, window_params = [{transform_indices = @transform_0, window_bounds = array<i64: 1, 4, 32, 16>}, {pipeline_mode = #tpu.pipeline_mode<synchronous>, transform_indices = @transform_1, window_bounds = array<i64: 32, 32>}, {transform_indices = @transform_2, window_bounds = array<i64: 1, 32, 64>}]} {
    %c0 = arith.constant 0 : index
    %c0_0 = arith.constant 0 : index
    %c0_1 = arith.constant 0 : index
    %c0_2 = arith.constant 0 : index
    %0 = vector.load %arg2[%c0, %c0_0, %c0_1, %c0_2] : memref<1x4x32x16xf32, #tpu.memory_space<vmem>>, vector<1x1x32x16xf32>
    %1 = vector.shape_cast %0 : vector<1x1x32x16xf32> to vector<32x16xf32>
    %c0_3 = arith.constant 0 : index
    %c3 = arith.constant 3 : index
    %c0_4 = arith.constant 0 : index
    %c0_5 = arith.constant 0 : index
    %2 = vector.load %arg2[%c0_3, %c3, %c0_4, %c0_5] : memref<1x4x32x16xf32, #tpu.memory_space<vmem>>, vector<1x1x32x16xf32>
    %3 = vector.shape_cast %2 : vector<1x1x32x16xf32> to vector<32x16xf32>
    %4 = arith.addf %1, %3 : vector<32x16xf32>
    %5 = arith.subf %1, %3 : vector<32x16xf32>
    %c0_6 = arith.constant 0 : index
    %c1 = arith.constant 1 : index
    %c0_7 = arith.constant 0 : index
    %c0_8 = arith.constant 0 : index
    %6 = vector.load %arg2[%c0_6, %c1, %c0_7, %c0_8] : memref<1x4x32x16xf32, #tpu.memory_space<vmem>>, vector<1x1x32x16xf32>
    %7 = vector.shape_cast %6 : vector<1x1x32x16xf32> to vector<32x16xf32>
    %c0_9 = arith.constant 0 : index
    %c2 = arith.constant 2 : index
    %c0_10 = arith.constant 0 : index
    %c0_11 = arith.constant 0 : index
    %8 = vector.load %arg2[%c0_9, %c2, %c0_10, %c0_11] : memref<1x4x32x16xf32, #tpu.memory_space<vmem>>, vector<1x1x32x16xf32>
    %9 = vector.shape_cast %8 : vector<1x1x32x16xf32> to vector<32x16xf32>
    %10 = arith.addf %7, %9 : vector<32x16xf32>
    %11 = arith.subf %7, %9 : vector<32x16xf32>
    %c0_12 = arith.constant 0 : index
    %c0_13 = arith.constant 0 : index
    %12 = vector.load %arg3[%c0_12, %c0_13] : memref<32x32xbf16, #tpu.memory_space<vmem>>, vector<32x32xbf16>
    %13 = arith.subf %4, %10 : vector<32x16xf32>
    %14 = arith.addf %5, %11 : vector<32x16xf32>
    %15 = tpu.concatenate %13, %14 in 1 : vector<32x16xf32>, vector<32x16xf32> -> vector<32x32xf32>
    %16 = arith.truncf %15 : vector<32x32xf32> to vector<32x32xbf16>
    %17 = arith.extf %16 : vector<32x32xbf16> to vector<32x32xf32>
    %18 = arith.subf %15, %17 : vector<32x32xf32>
    %19 = arith.truncf %18 : vector<32x32xf32> to vector<32x32xbf16>
    %20 = arith.extf %19 : vector<32x32xbf16> to vector<32x32xf32>
    %21 = arith.subf %18, %20 : vector<32x32xf32>
    %22 = arith.truncf %21 : vector<32x32xf32> to vector<32x32xbf16>
    %cst = arith.constant dense<0.000000e+00> : vector<32x32xf32>
    %23 = tpu.matmul %16, %12, %cst {dimension_numbers = #tpu.dot_dimension_numbers<[1], [0], [0], [1], [0, 0, 1, 1], [], []>} : vector<32x32xbf16>, vector<32x32xbf16>, vector<32x32xf32> -> vector<32x32xf32>
    %cst_14 = arith.constant dense<0.000000e+00> : vector<32x32xf32>
    %24 = tpu.matmul %19, %12, %cst_14 {dimension_numbers = #tpu.dot_dimension_numbers<[1], [0], [0], [1], [0, 0, 1, 1], [], []>} : vector<32x32xbf16>, vector<32x32xbf16>, vector<32x32xf32> -> vector<32x32xf32>
    %25 = arith.addf %23, %24 : vector<32x32xf32>
    %cst_15 = arith.constant dense<0.000000e+00> : vector<32x32xf32>
    %26 = tpu.matmul %22, %12, %cst_15 {dimension_numbers = #tpu.dot_dimension_numbers<[1], [0], [0], [1], [0, 0, 1, 1], [], []>} : vector<32x32xbf16>, vector<32x32xbf16>, vector<32x32xf32> -> vector<32x32xf32>
    %27 = arith.addf %25, %26 : vector<32x32xf32>
    %28 = arith.subf %5, %11 : vector<32x16xf32>
    %29 = arith.addf %4, %10 : vector<32x16xf32>
    %30 = tpu.concatenate %28, %29 in 1 : vector<32x16xf32>, vector<32x16xf32> -> vector<32x32xf32>
    %31 = arith.truncf %30 : vector<32x32xf32> to vector<32x32xbf16>
    %32 = arith.extf %31 : vector<32x32xbf16> to vector<32x32xf32>
    %33 = arith.subf %30, %32 : vector<32x32xf32>
    %34 = arith.truncf %33 : vector<32x32xf32> to vector<32x32xbf16>
    %35 = arith.extf %34 : vector<32x32xbf16> to vector<32x32xf32>
    %36 = arith.subf %33, %35 : vector<32x32xf32>
    %37 = arith.truncf %36 : vector<32x32xf32> to vector<32x32xbf16>
    %cst_16 = arith.constant dense<0.000000e+00> : vector<32x32xf32>
    %38 = tpu.matmul %31, %12, %cst_16 {dimension_numbers = #tpu.dot_dimension_numbers<[1], [0], [0], [1], [0, 0, 1, 1], [], []>} : vector<32x32xbf16>, vector<32x32xbf16>, vector<32x32xf32> -> vector<32x32xf32>
    %cst_17 = arith.constant dense<0.000000e+00> : vector<32x32xf32>
    %39 = tpu.matmul %34, %12, %cst_17 {dimension_numbers = #tpu.dot_dimension_numbers<[1], [0], [0], [1], [0, 0, 1, 1], [], []>} : vector<32x32xbf16>, vector<32x32xbf16>, vector<32x32xf32> -> vector<32x32xf32>
    %40 = arith.addf %38, %39 : vector<32x32xf32>
    %cst_18 = arith.constant dense<0.000000e+00> : vector<32x32xf32>
    %41 = tpu.matmul %37, %12, %cst_18 {dimension_numbers = #tpu.dot_dimension_numbers<[1], [0], [0], [1], [0, 0, 1, 1], [], []>} : vector<32x32xbf16>, vector<32x32xbf16>, vector<32x32xf32> -> vector<32x32xf32>
    %42 = arith.addf %40, %41 : vector<32x32xf32>
    %43 = tpu.concatenate %27, %42 in 1 : vector<32x32xf32>, vector<32x32xf32> -> vector<32x64xf32>
    %c0_19 = arith.constant 0 : index
    %c0_20 = arith.constant 0 : index
    %c0_21 = arith.constant 0 : index
    %44 = vector.load %arg4[%c0_19, %c0_20, %c0_21] : memref<1x32x64xf32, #tpu.memory_space<vmem>>, vector<1x32x64xf32>
    %45 = vector.shape_cast %44 : vector<1x32x64xf32> to vector<32x64xf32>
    %46 = vector.shape_cast %43 : vector<32x64xf32> to vector<1x32x64xf32>
    tpu.vector_store %arg4[%c0_19, %c0_20, %c0_21], %46 {strides = array<i32>} : memref<1x32x64xf32, #tpu.memory_space<vmem>>, vector<1x32x64xf32>,
    return
  }
  func.func @transform_0(%arg0: i32, %arg1: i32) -> (i32, i32, i32, i32) {
    %c0_i32 = arith.constant 0 : i32
    %c0_i32_0 = arith.constant 0 : i32
    %c0_i32_1 = arith.constant 0 : i32
    return %arg0, %c0_i32, %arg1, %c0_i32_0 : i32, i32, i32, i32
  }
  func.func @transform_1(%arg0: i32, %arg1: i32) -> (i32, i32) {
    %c0_i32 = arith.constant 0 : i32
    %c0_i32_0 = arith.constant 0 : i32
    %c0_i32_1 = arith.constant 0 : i32
    return %c0_i32, %c0_i32_0 : i32, i32
  }
  func.func @transform_2(%arg0: i32, %arg1: i32) -> (i32, i32, i32) {
    %c0_i32 = arith.constant 0 : i32
    %c0_i32_0 = arith.constant 0 : i32
    return %arg0, %arg1, %c0_i32 : i32, i32, i32
  }
}

</mosaic_0001>

<bundles_post_ra>
// kernel: tpu_custom_call.1
= control target key start
LH: loop header
LB: loop body
LE: loop exit
PB: predicated region body
PF: predicated region fallthrough
CT: control target
= control target key end

     0   :  { %7 = vsyncpa [#allocation4], 0  ;;  %s1480_s0 = inlined_call_operand.vmem [shape: f32[2,4,64,16], index: 0, kind: input, shape index: {}]   ;;  %s1481_s1 = inlined_call_operand.vmem [shape: bf16[32,32], index: 1, kind: input, shape index: {}]   ;;  %s1482_s2 = inlined_call_operand.hbm [shape: f32[2,64,64], index: 2, kind: output, shape index: {}]  }
   0x1   :  { %9 = vsyncpa [#allocation4 + $0x1], 0  ;;  %s1199_s9 = smov 0   ;;  %s1201_s10 = smov 0  }
   0x2   :  { %s1203_s11 = smov 0   ;;  %s1205_s12 = smov 0  }
   0x3   :  { %s1207_s13 = smov 0   ;;  %s1209_s14 = smov 0  }
   0x4   :  { %s1211_s15 = smov 0   ;;  %s1213_s16 = smov 0  }
   0x5 LB: > { %s875_s17 = sadd.s32 4294967295, %s1177_s16   ;;  %s876_s18 = sadd.s32 4294967294, %s1177_s16   ;;  %s1177_s16 = sphi %s1213_s16, %s15_s16   ;;  %s1173_s15 = sphi %s1211_s15, %s1492_s15   ;;  %s1169_s14 = sphi %s1209_s14, %s1491_s14   ;;  %s1165_s13 = sphi %s1207_s13, %s1490_s13   ;;  %s1161_s12 = sphi %s1205_s12, %s1489_s12   ;;  %s1157_s11 = sphi %s1203_s11, %s1488_s11   ;;  %s1153_s10 = sphi %s1201_s10, %s1487_s10   ;;  %s1149_s9 = sphi %s1199_s9, %s1486_s9  }
   0x6   : > { %s24_s19 = sadd.s32 1, %s1169_s14  ;;  %s27_s20 = sadd.s32 1, %s1173_s15 }
   0x7   : > { %p25_p0 = scmp.ge.s32.totalorder %s24_s19, 2  ;;  %p43_p1 = scmp.ne.s32.totalorder %s1157_s11, %s1153_s10 }
   0x8   : > { %p44_p2 = scmp.eq.s32.totalorder %s1177_s16, 0  ;;  %p96_p5 = scmp.eq.s32.totalorder %s875_s17, 3 }
   0x9   : > { %s1494_s19 = smov (%p25_p0, %s24_s19), 0  ;;  %s1496_s20 = smov (!%p25_p0, %s27_s20), %s1173_s15 }
   0xa   : > { %s32_s21 = ssub.s32 %s1169_s14, %s1494_s19  ;;  %p1251_p3 = por %p44_p2, %p43_p1 }
   0xb   : > { %p29_p4 = scmp.ge.s32.totalorder %s1496_s20, 2  ;;  %p101_p6 = scmp.ne.s32.totalorder %s1153_s10, %s1149_s9 }
   0xc   : > { %p102_p7 = scmp.eq.s32.totalorder %s876_s18, 3  ;;  %p1259_p8 = por %p96_p5, %p43_p1 }
   0xd   : > { %s1498_s20 = smov (%p29_p4, %s1496_s20), 0  ;;  %s36_s27 = sadd.s32 1, %s1157_s11 }
   0xe   : > { %p1263_p9 = por %p102_p7, %p101_p6  ;;  %s31_s25 = ssub.s32 %s1173_s15, %s1498_s20 }
   0xf   : > { %s33_s26 = sor.u32 %s32_s21, %s31_s25  ;;  %p878_p11 = scmp.ge.s32.totalorder %s1177_s16, 4 }
  0x10   : > { %p34_p10 = scmp.eq.s32.totalorder %s33_s26, 0 }
  0x11   : > { %121 = sbr.rel (%p878_p11) target bundleno = 39 (0x27), region = 20 }
  0x12   : > { %s1271_s28 = scalar_select %p34_p10, %s1157_s11, %s36_s27  }
  0x18   : > { %124 = sbr.rel (!%p1251_p3) target bundleno = 39 (0x27), region = 24  ;;  %s126_s29 = sand.u32 (%p1251_p3), 1, %s1157_s11  }
  0x19   : > { %s880_s30 = sshll.u32 (%p1251_p3), %s1169_s14, 2  ;;  %s879_s3 = sshll.u32 (%p1251_p3), %s126_s29, 7 }
  0x1a   : > { %s881_s4 = sshll.u32 (%p1251_p3), %s1173_s15, 5  ;;  %s128_s18 = scalar_lea.vmem (%p1251_p3), [#allocation2], %s879_s3 }
  0x1b   : > { %s131_s5 = sadd.s32 (%p1251_p3), %s881_s4, %s880_s30 }
  0x1c   : > { %s882_s6 = sshll.u32 (%p1251_p3), %s131_s5, 3 }
  0x1d   : > { %s1282_s17 = scalar_lea.vmem (%p1251_p3), %s1480_s0, %s882_s6 }
  0x1e   : > { %v191_v0 = vld [vmem:[%s1282_s17] sm:$0xff] (%p1251_p3)  ;;  %v193_v1 = vld [vmem:[%s1282_s17 + $0x8] sm:$0xff] (%p1251_p3)  ;;  %v195_v2 = vld [vmem:[%s1282_s17 + $0x10] sm:$0xff] (%p1251_p3) }
  0x1f   : > { %192 = vst [vmem:[%s128_s18] sm:$0xff] %v191_v0  ;;  %194 = vst [vmem:[%s128_s18 + $0x8] sm:$0xff] %v193_v1  ;;  %v197_v3 = vld [vmem:[%s1282_s17 + $0x18] sm:$0xff]  ;;  %v199_v4 = vld [vmem:[%s1282_s17 + $0x40] sm:$0xff] }
  0x20   : > { %196 = vst [vmem:[%s128_s18 + $0x10] sm:$0xff] %v195_v2  ;;  %v201_v5 = vld [vmem:[%s1282_s17 + $0x48] sm:$0xff]  ;;  %198 = vst [vmem:[%s128_s18 + $0x18] sm:$0xff] %v197_v3  ;;  %v203_v6 = vld [vmem:[%s1282_s17 + $0x50] sm:$0xff] }
  0x21   : > { %200 = vst [vmem:[%s128_s18 + $0x20] sm:$0xff] %v199_v4  ;;  %202 = vst [vmem:[%s128_s18 + $0x28] sm:$0xff] %v201_v5  ;;  %v205_v7 = vld [vmem:[%s1282_s17 + $0x58] sm:$0xff]  ;;  %v207_v8 = vld [vmem:[%s1282_s17 + $0x80] sm:$0xff] }
  0x22   : > { %204 = vst [vmem:[%s128_s18 + $0x30] sm:$0xff] %v203_v6  ;;  %206 = vst [vmem:[%s128_s18 + $0x38] sm:$0xff] %v205_v7  ;;  %v209_v9 = vld [vmem:[%s1282_s17 + $0x88] sm:$0xff]  ;;  %v211_v10 = vld [vmem:[%s1282_s17 + $0x90] sm:$0xff] }
  0x23   : > { %208 = vst [vmem:[%s128_s18 + $0x40] sm:$0xff] %v207_v8  ;;  %v213_v11 = vld [vmem:[%s1282_s17 + $0x98] sm:$0xff]  ;;  %210 = vst [vmem:[%s128_s18 + $0x48] sm:$0xff] %v209_v9  ;;  %v215_v12 = vld [vmem:[%s1282_s17 + $0xc0] sm:$0xff] }
  0x24   : > { %212 = vst [vmem:[%s128_s18 + $0x50] sm:$0xff] %v211_v10  ;;  %214 = vst [vmem:[%s128_s18 + $0x58] sm:$0xff] %v213_v11  ;;  %v217_v13 = vld [vmem:[%s1282_s17 + $0xc8] sm:$0xff]  ;;  %v219_v14 = vld [vmem:[%s1282_s17 + $0xd0] sm:$0xff] }
  0x25   : > { %216 = vst [vmem:[%s128_s18 + $0x60] sm:$0xff] %v215_v12  ;;  %218 = vst [vmem:[%s128_s18 + $0x68] sm:$0xff] %v217_v13  ;;  %v221_v15 = vld [vmem:[%s1282_s17 + $0xd8] sm:$0xff] }
  0x26   : > { %220 = vst [vmem:[%s128_s18 + $0x70] sm:$0xff] %v219_v14  ;;  %222 = vst [vmem:[%s128_s18 + $0x78] sm:$0xff] %v221_v15 }
  0x27 PF: > { %p883_p12 = scmp.ge.s32.totalorder %s1177_s16, 1  ;;  %p227_p13 = scmp.lt.s32.totalorder %s1177_s16, 5 }
  0x29   : > { %p228_p0 = pnand %p883_p12, %p227_p13 }
  0x2a   : > { %s1303_s21 = sand.u32 (!%p228_p0), 1, %s1153_s10   ;;  %v1309_v16 = vld [vmem:[%s1481_s1] sm:$0xff] (!%p228_p0)   ;;  %v1356_v48 = vld [vmem:[%s1481_s1 + $0x8] sm:$0xff] (!%p228_p0)   ;;  %s1179_s3 = smov (!%p228_p0), 16   ;;  %vm321_vm0 = vcmask (!%p228_p0), 130048   ;;  %vm360_vm1 = vcmask (!%p228_p0), 261120  }
  0x2b   : > { %231 = sbr.rel (%p228_p0) target bundleno = 556 (0x22c), region = 62  ;;  %s884_s22 = sshll.u32 (!%p228_p0), %s1303_s21, 7  ;;  %966 = vmatprep.subr.bf16.mxu1 (!%p228_p0), %v1309_v16  ;;  %942 = vmatprep.subr.bf16.mxu0 (!%p228_p0), %v1309_v16  ;;  %vm769_vm2 = vcmask (!%p228_p0), 523264  }
  0x2c   : > { %s1311_s27 = scalar_lea.vmem (!%p228_p0), [#allocation2], %s884_s22  ;;  %967 = vmatpush3.bf16.msra.mxu1 (!%p228_p0), %v1309_v16  ;;  %943 = vmatpush3.bf16.msra.mxu0 (!%p228_p0), %v1309_v16  ;;  %s1180_s4 = smov (!%p228_p0), 32  }
  0x2d   : > { %v260_v17 = vld [vmem:[%s1311_s27 + $0x10] sm:$0xff] (!%p228_p0)  ;;  %v258_v22 = vld [vmem:[%s1311_s27] sm:$0xff] (!%p228_p0)  ;;  %v261_v28 = vld [vmem:[%s1311_s27 + $0x18] sm:$0xff] (!%p228_p0)  ;;  %968 = vmatprep.subr.bf16.mxu1 (!%p228_p0), %v1356_v48  ;;  %944 = vmatprep.subr.bf16.mxu0 (!%p228_p0), %v1356_v48  ;;  %s885_s5 = sshll.u32 (!%p228_p0), %s1303_s21, 5  ;;  %s913_s6 = sshll.u32 (!%p228_p0), %s1161_s12, 2 }
  0x2e   : > { %v888_v18 = vld [vmem:[%s1311_s27 + $0x70] sm:$0xff] (!%p228_p0)  ;;  %v886_v23 = vld [vmem:[%s1311_s27 + $0x60] sm:$0xff] (!%p228_p0)  ;;  %v889_v33 = vld [vmem:[%s1311_s27 + $0x78] sm:$0xff] (!%p228_p0)  ;;  %s914_s7 = sshll.u32 (!%p228_p0), %s1165_s13, 3  ;;  %s254_s17 = scalar_lea.vmem (!%p228_p0), [#allocation3], %s885_s5 }
  0x2f   : > { %v892_v19 = vld [vmem:[%s1311_s27 + $0x30] sm:$0xff] (!%p228_p0)  ;;  %v1318_v20 = vadd.f32 (!%p228_p0), %v888_v18, %v260_v17  ;;  %v1327_v25 = vadd.f32 (!%p228_p0), %v886_v23, %v258_v22  ;;  %v890_v26 = vld [vmem:[%s1311_s27 + $0x20] sm:$0xff] (!%p228_p0)  ;;  %v273_v29 = vsub.f32 (!%p228_p0), %v260_v17, %v888_v18  ;;  %v271_v31 = vsub.f32 (!%p228_p0), %v258_v22, %v886_v23  ;;  %v893_v34 = vld [vmem:[%s1311_s27 + $0x38] sm:$0xff] (!%p228_p0)  ;;  %s787_s8 = sadd.s32 (!%p228_p0), %s914_s7, %s913_s6  ;;  %s790_s18 = sshll.u32 (!%p228_p0), %s254_s17, 4  ;;  %s1416_s18 = int_to_ptr.vmem [resolvable:$true] %s790_s18 }
  0x30   : > { %v896_v21 = vld [vmem:[%s1311_s27 + $0x50] sm:$0xff] (!%p228_p0)  ;;  %v894_v27 = vld [vmem:[%s1311_s27 + $0x40] sm:$0xff] (!%p228_p0)  ;;  %v897_v35 = vld [vmem:[%s1311_s27 + $0x58] sm:$0xff] (!%p228_p0)  ;;  %v1341_v38 = vadd.f32 (!%p228_p0), %v889_v33, %v261_v28  ;;  %v274_v53 = vsub.f32 (!%p228_p0), %v261_v28, %v889_v33  ;;  %969 = vmatpush3.bf16.msra.mxu1 (!%p228_p0), %v1356_v48  ;;  %945 = vmatpush3.bf16.msra.mxu0 (!%p228_p0), %v1356_v48  ;;  %s915_s22 = sshll.u32 (!%p228_p0), %s787_s8, 7  ;;  %s775_s26 = scalar_lea.sflag (!%p228_p0), [#allocation4], %s1303_s21 }
  0x31   : > { %v1325_v24 = vadd.f32 (!%p228_p0), %v896_v21, %v892_v19  ;;  %v291_v30 = vsub.f32 (!%p228_p0), %v892_v19, %v896_v21  ;;  %v1332_v32 = vadd.f32 (!%p228_p0), %v894_v27, %v890_v26  ;;  %v1343_v39 = vadd.f32 (!%p228_p0), %v897_v35, %v893_v34  ;;  %v259_v40 = vld [vmem:[%s1311_s27 + $0x8] sm:$0xff] (!%p228_p0)  ;;  %974 = vmatprep.subr.bf16.mxu1 (!%p228_p0), %v1309_v16  ;;  %s1423_s25 = scalar_lea.hbm (!%p228_p0), %s1482_s2, %s915_s22  ;;  %s1181_s29 = smov (!%p228_p0), [#allocation3]  }
  0x32   : > { %v887_v41 = vld [vmem:[%s1311_s27 + $0x68] sm:$0xff]  ;;  %v289_v43 = vsub.f32 %v890_v26, %v894_v27  ;;  %v292_v54 = vsub.f32 %v893_v34, %v897_v35  ;;  %950 = vmatprep.subr.bf16.mxu0 %v1309_v16  ;;  %s1087_s30 = sshll.u32 %s1181_s29, 4  ;;  %s1088_s30 = int_to_ptr.vmem [resolvable:$false] %s1087_s30 }
  0x33   : > { %v536_v36 = vadd.f32 %v1325_v24, %v1318_v20  ;;  %v299_v37 = vsub.f32 %v1318_v20, %v1325_v24  ;;  %v891_v42 = vld [vmem:[%s1311_s27 + $0x28] sm:$0xff]  ;;  %v534_v44 = vadd.f32 %v1332_v32, %v1327_v25  ;;  %v297_v45 = vsub.f32 %v1327_v25, %v1332_v32  ;;  %p1090_p4 = scmp.lt.s32.totalorder %s1416_s18, %s1088_s30 }
  0x34   : > { %v268_v46 = vadd.f32 %v887_v41, %v259_v40  ;;  %v895_v47 = vld [vmem:[%s1311_s27 + $0x48] sm:$0xff]  ;;  %v537_v49 = vadd.f32 %v1343_v39, %v1341_v38  ;;  %v272_v51 = vsub.f32 %v259_v40, %v887_v41  ;;  %v532_v55 = vsub.f32 %v273_v29, %v291_v30  ;;  %s1083_s27 = scalar_lea.vmem %s1416_s18, 512 }
  0x35   : > { %546 = vrot.lane.b32.xlu1 %v536_v36, %s1179_s3  ;;  %v286_v50 = vadd.f32 %v895_v47, %v891_v42  ;;  %v290_v52 = vsub.f32 %v891_v42, %v895_v47  ;;  %542 = vrot.lane.b32.xlu0 %v534_v44, %s1179_s3  ;;  %v530_v57 = vsub.f32 %v271_v31, %v289_v43  ;;  %p1084_p1 = scmp.ne.s32.totalorder %s1416_s18, %s1083_s27 }
  0x36   : > { %v533_v59 = vsub.f32 %v274_v53, %v292_v54  ;;  %v301_v61 = vadd.f32 %v289_v43, %v271_v31  ;;  %v304_v62 = vadd.f32 %v292_v54, %v274_v53  ;;  %v303_v63 = vadd.f32 %v291_v30, %v273_v29 }
  0x37   : > { %v535_v56 = vadd.f32 %v286_v50, %v268_v46  ;;  %v531_v58 = vsub.f32 %v272_v51, %v290_v52  ;;  %v302_v60 = vadd.f32 %v290_v52, %v272_v51  ;;  %v298_v0 = vsub.f32 %v268_v46, %v286_v50  ;;  %p1085_p2 = pnand %p1084_p1, %p1259_p8 }
  0x38   : > { %v300_v1 = vsub.f32 %v1341_v38, %v1343_v39 }
  0x39   : > { %548 = vrot.lane.b32.xlu1 %v537_v49, %s1179_s3  ;;  %544 = vrot.lane.b32.xlu0 %v535_v56, %s1179_s3  ;;  %p1086_p3 = pneg %p1085_p2 }
  0x3d   : > { %311 = vrot.lane.b32.xlu1 %v302_v60, %s1179_s3  ;;  %309 = vrot.lane.b32.xlu0 %v301_v61, %s1179_s3 }
  0x41   : > { %315 = vrot.lane.b32.xlu1 %v304_v62, %s1179_s3  ;;  %313 = vrot.lane.b32.xlu0 %v303_v63, %s1179_s3  ;;  %s1089_s3 = scalar_lea.vmem %s1088_s30, 1024 }
  0x42   : > { %p1091_p5 = scmp.lt.s32.totalorder %s1089_s3, %s1083_s27 }
  0x44   : > { %p1092_p6 = por %p1091_p5, %p1090_p4 }
  0x46   : > { %p1093_p7 = pnand %p1092_p6, %p1086_p3 }
  0xa7   : > { %v547_v2 = vpop.permute.xlu1 %546  ;;  %v543_v3 = vpop.permute.xlu0 %542 }
  0xa8   : > { %v556_v5 = vsel %vm321_vm0, %v532_v55, %v547_v2  ;;  %v554_v8 = vsel %vm321_vm0, %v530_v57, %v543_v3 }
  0xab   : > { %v549_v4 = vpop.permute.xlu1 %548  ;;  %v545_v7 = vpop.permute.xlu0 %544 }
  0xac   : > { %v557_v6 = vsel %vm321_vm0, %v533_v59, %v549_v4  ;;  %v555_v10 = vsel %vm321_vm0, %v531_v58, %v545_v7 }
  0xad   : > { %v1371_v9 = vpack.c.bf16 %v557_v6, %v556_v5  ;;  %v558_v11 = vpack.c.bf16 %v555_v10, %v554_v8 }
  0xaf   : > { %v562_v12 = vunpack.c.l.bf16 %v1371_v9  ;;  %v563_v13 = vunpack.c.h.bf16 %v1371_v9  ;;  %v312_v14 = vpop.permute.xlu1 %311  ;;  %v560_v15 = vunpack.c.l.bf16 %v558_v11  ;;  %v561_v17 = vunpack.c.h.bf16 %v558_v11  ;;  %v310_v19 = vpop.permute.xlu0 %309 }
  0xb0   : > { %v323_v18 = vsel %vm321_vm0, %v298_v0, %v312_v14  ;;  %v322_v23 = vsel %vm321_vm0, %v297_v45, %v310_v19 }
  0xb1   : > { %v566_v21 = vsub.f32 %v556_v5, %v562_v12  ;;  %v567_v22 = vsub.f32 %v557_v6, %v563_v13  ;;  %v565_v25 = vsub.f32 %v555_v10, %v561_v17  ;;  %v564_v26 = vsub.f32 %v554_v8, %v560_v15 }
  0xb2   : > { %v326_v27 = vpack.c.bf16 %v323_v18, %v322_v23 }
  0xb3   : > { %v569_v28 = vpack.c.bf16 %v567_v22, %v566_v21  ;;  %v316_v29 = vpop.permute.xlu1 %315  ;;  %v568_v30 = vpack.c.bf16 %v565_v25, %v564_v26  ;;  %v314_v34 = vpop.permute.xlu0 %313 }
  0xb4   : > { %v328_v31 = vunpack.c.l.bf16 %v326_v27  ;;  %v329_v32 = vunpack.c.h.bf16 %v326_v27  ;;  %v325_v33 = vsel %vm321_vm0, %v300_v1, %v316_v29  ;;  %v324_v38 = vsel %vm321_vm0, %v299_v37, %v314_v34 }
  0xb5   : > { %v572_v35 = vunpack.c.l.bf16 %v569_v28  ;;  %v573_v36 = vunpack.c.h.bf16 %v569_v28  ;;  %v570_v39 = vunpack.c.l.bf16 %v568_v30  ;;  %v571_v40 = vunpack.c.h.bf16 %v568_v30  ;;  %970 = vmatprep.mubr.msk.bf16.mxu1 %vm360_vm1, %v568_v30 }
  0xb6   : > { %v332_v41 = vsub.f32 %v322_v23, %v328_v31  ;;  %v327_v42 = vpack.c.bf16 %v325_v33, %v324_v38  ;;  %971 = vmatmul.mubr.msk.bf16.vlgmr.msra.gmra.mrb[0].mxu1 %vm360_vm1, %v569_v28  ;;  %v333_v45 = vsub.f32 %v323_v18, %v329_v32 }
  0xb7   : > { %v576_v43 = vsub.f32 %v566_v21, %v572_v35  ;;  %v577_v44 = vsub.f32 %v567_v22, %v573_v36  ;;  %v574_v46 = vsub.f32 %v564_v26, %v570_v39  ;;  %975 = vmatpush3.bf16.msra.mxu1 %v1309_v16  ;;  %978 = vmatprep.mubr.msk.bf16.mxu1 %vm360_vm1, %v558_v11 }
  0xb8   : > { %v575_v47 = vsub.f32 %v565_v25, %v571_v40  ;;  %v330_v20 = vunpack.c.l.bf16 %v327_v42  ;;  %v331_v24 = vunpack.c.h.bf16 %v327_v42  ;;  %976 = vmatprep.subr.bf16.mxu1 %v1356_v48  ;;  %v336_v49 = vpack.c.bf16 %v333_v45, %v332_v41 }
  0xb9   : > { %v579_v37 = vpack.c.bf16 %v577_v44, %v576_v43 }
  0xba   : > { %v578_v50 = vpack.c.bf16 %v575_v47, %v574_v46  ;;  %v334_v51 = vsub.f32 %v324_v38, %v330_v20  ;;  %v335_v52 = vsub.f32 %v325_v33, %v331_v24  ;;  %v338_v53 = vunpack.c.l.bf16 %v336_v49  ;;  %946 = vmatprep.mubr.msk.bf16.mxu0 %vm360_vm1, %v336_v49 }
  0xbb   : > { %v339_v54 = vunpack.c.h.bf16 %v336_v49  ;;  %977 = vmatpush3.bf16.msra.mxu1 %v1356_v48 }
  0xbc   : > { %v337_v55 = vpack.c.bf16 %v335_v52, %v334_v51  ;;  %982 = vmatprep.subr.bf16.mxu1 %v1309_v16  ;;  %v342_v57 = vsub.f32 %v332_v41, %v338_v53 }
  0xbd   : > { %v343_v56 = vsub.f32 %v333_v45, %v339_v54 }
  0xbe   : > { %v340_v58 = vunpack.c.l.bf16 %v337_v55  ;;  %v341_v59 = vunpack.c.h.bf16 %v337_v55  ;;  %947 = vmatmul.mubr.msk.bf16.vlgmr.msra.gmra.mrb[0].mxu0 %vm360_vm1, %v337_v55 }
  0xbf   : > { %951 = vmatpush3.bf16.msra.mxu0 %v1309_v16  ;;  %954 = vmatprep.mubr.msk.bf16.mxu0 %vm360_vm1, %v326_v27  ;;  %v346_v60 = vpack.c.bf16 %v343_v56, %v342_v57 }
  0xc0   : > { %v344_v61 = vsub.f32 %v334_v51, %v340_v58  ;;  %v345_v62 = vsub.f32 %v335_v52, %v341_v59  ;;  %952 = vmatprep.subr.bf16.mxu0 %v1356_v48 }
  0xc2   : > { %v347_v63 = vpack.c.bf16 %v345_v62, %v344_v61  ;;  %979 = vmatmul.mubr.msk.bf16.vlgmr.msra.gmra.mrb[0].mxu1 %vm360_vm1, %v1371_v9 }
  0xc3   : > { %953 = vmatpush3.bf16.msra.mxu0 %v1356_v48  ;;  %983 = vmatpush3.bf16.msra.mxu1 %v1309_v16 }
  0xc4   : > { %986 = vmatprep.mubr.msk.bf16.mxu1 %vm360_vm1, %v578_v50  ;;  %984 = vmatprep.subr.bf16.mxu1 %v1356_v48 }
  0xc5   : > { %958 = vmatprep.subr.bf16.mxu0 %v1309_v16 }
  0xc7   : > { %985 = vmatpush3.bf16.msra.mxu1 %v1356_v48 }
  0xca   : > { %955 = vmatmul.mubr.msk.bf16.vlgmr.msra.gmra.mrb[0].mxu0 %vm360_vm1, %v327_v42 }
  0xcb   : > { %959 = vmatpush3.bf16.msra.mxu0 %v1309_v16  ;;  %962 = vmatprep.mubr.msk.bf16.mxu0 %vm360_vm1, %v346_v60 }
  0xcc   : > { %960 = vmatprep.subr.bf16.mxu0 %v1356_v48 }
  0xce   : > { %987 = vmatmul.mubr.msk.bf16.vlgmr.msra.gmra.mrb[0].mxu1 %vm360_vm1, %v579_v37 }
  0xcf   : > { %961 = vmatpush3.bf16.msra.mxu0 %v1356_v48 }
  0xd6   : > { %963 = vmatmul.mubr.msk.bf16.vlgmr.msra.gmra.mrb[0].mxu0 %vm360_vm1, %v347_v63 }
 0x1a1   : > { %v988_v0 = vpop.f32.mrb[0].mxu1 }
 0x1a2   : > { %v730_v1 = vpop.f32.mrb[1].mxu1 }
 0x1a3   : > { %753 = vrot.lane.b32.xlu0 %v730_v1, %s1180_s4  ;;  %v989_v2 = vpop.f32.mrb[2].mxu1 }
 0x1a4   : > { %v733_v3 = vpop.f32.mrb[3].mxu1 }
 0x1a5   : > { %755 = vrot.lane.b32.xlu1 %v733_v3, %s1180_s4 }
 0x1a7   : > { %757 = vrot.lane.b32.xlu0 %v988_v0, %s1180_s4 }
 0x1a9   : > { %v964_v16 = vpop.f32.mrb[0].mxu0  ;;  %759 = vrot.lane.b32.xlu1 %v989_v2, %s1180_s4 }
 0x1aa   : > { %v511_v4 = vpop.f32.mrb[1].mxu0 }
 0x1ab   : > { %v965_v5 = vpop.f32.mrb[2].mxu0 }
 0x1ac   : > { %v514_v6 = vpop.f32.mrb[3].mxu0 }
 0x215   : > { %v754_v48 = vpop.permute.xlu0 %753 }
 0x216   : > { %v765_v7 = vsel %vm360_vm1, %v511_v4, %v754_v48 }
 0x217   : > { %770 = vst.msk [vmem:[%s254_s17] sm:$0xff] %vm769_vm2, %v765_v7  ;;  %v756_v8 = vpop.permute.xlu1 %755 }
 0x218   : > { %v766_v9 = vsel %vm360_vm1, %v514_v6, %v756_v8 }
 0x219   : > { %771 = vst.msk [vmem:[%s254_s17 + $0x8] sm:$0xff] %vm769_vm2, %v766_v9  ;;  %v758_v10 = vpop.permute.xlu0 %757 }
 0x21a   : > { %v767_v11 = vsel %vm360_vm1, %v964_v16, %v758_v10 }
 0x21b   : > { %772 = vst.msk [vmem:[%s254_s17 + $0x10] sm:$0xff] %vm769_vm2, %v767_v11  ;;  %v760_v12 = vpop.permute.xlu1 %759 }
 0x21c   : > { %v768_v13 = vsel %vm360_vm1, %v965_v5, %v760_v12 }
 0x21d   : > { %773 = vst.msk [vmem:[%s254_s17 + $0x18] sm:$0xff] %vm769_vm2, %v768_v13 }
 0x21e   : > { %1096 = shalt.err (!%p1093_p7)
}
 0x21f   : > { %s1097_s4 = scalar_lea.hbm %s1423_s25, 512  ;;  %s1101_s7 = scalar_lea.hbm %s1482_s2, 2048 }
 0x220   : > { %p1098_p10 = scmp.ne.s32.totalorder %s1423_s25, %s1097_s4  ;;  %p1102_p13 = scmp.lt.u32.totalorder %s1423_s25, %s1482_s2 }
 0x221   : > { %p1103_p0 = scmp.lt.u32.totalorder %s1101_s7, %s1097_s4  ;;  %p1105_p2 = scmp.lt.u32.totalorder %s1097_s4, %s1423_s25 }
 0x222   : > { %p1099_p11 = pnand %p1098_p10, %p1259_p8 }
 0x223   : > { %p1104_p1 = por %p1103_p0, %p1102_p13 }
 0x224   : > { %p1100_p12 = pneg %p1099_p11 }
 0x225   : > { %p1106_p3 = por %p1105_p2, %p1104_p1 }
 0x227   : > { %p1107_p4 = pnand %p1106_p3, %p1100_p12 }
 0x229   : > { %1110 = shalt.err (!%p1107_p4)
}
 0x22a   : > { %s1182_s22 = smov 128   ;;  %s1183_s12 = smov 8  }
 0x22b   : > { %1006 = dma.vmem_to_hbm [thread:$0]  (%p1259_p8), %s1416_s18, 512, %s1423_s25, %s775_s26, %s1182_s22, %s1182_s22, %s1183_s12  }
 0x22c PF: > { %p1012_p5 = scmp.ge.s32.totalorder %s1177_s16, 2  ;;  %s805_s13 = sand.u32 1, %s1149_s9  }
 0x22d   : > { %s806_s27 = scalar_lea.sflag [#allocation4], %s805_s13 }
 0x22e   : > { %p1009_p6 = pnand %p1012_p5, %p1263_p9 }
 0x230   : > { %1144 = dma.done.wait (!%p1009_p6), %s806_s27, 512  }
 0x231   : > { %1146 = vsyncadd (!%p1009_p6), %s806_s27, 4294966784  ;;  %s15_s16 = sadd.s32 1, %s1177_s16   ;;  %s1486_s9 = smov %s1153_s10 }
 0x232   : > { %p12_p7 = scmp.ge.s32.totalorder %s15_s16, 6   ;;  %s1487_s10 = smov %s1157_s11 }
 0x233   : > { %s1488_s11 = smov %s1271_s28  ;;  %s1489_s12 = smov %s1169_s14 }
 0x234   : > { %s1490_s13 = smov %s1173_s15  ;;  %s1491_s14 = smov %s1494_s19 }
 0x235   : > { %s1492_s15 = smov %s1498_s20  ;;  %14 = sbr.rel (!%p12_p7) target bundleno = 5 (0x5), region = 109 }
 0x23c   :  { %811 = vsyncpa [#allocation4], 1 }
 0x23d   :  { %813 = vsyncpa [#allocation4 + $0x1], 1 }

</bundles_post_ra>
